<compile_context>
chip_gen: v7x
topology: tpu7x:2x2x1
jax: 0.10.0
libtpu: 0.0.40
codegen_flags: <defaults>
</compile_context>

<pallas_src>
import math
from functools import partial

import jax
import jax.numpy as jnp
from jax.experimental import pallas as pl
from jax.experimental.pallas import tpu as pltpu

LANE = 128      # TPU lane width: output slab padded to a multiple of this.
ROW_ALIGN = 16  # batch-tile granularity (bf16 sublane packing = 16 rows).


def _round_up(n, m):
    return ((n + m - 1) // m) * m


def _dqn_kernel(x_ref,
                w0_ref, b0_ref,
                w1_ref, b1_ref,
                w2_ref, b2_ref,
                w3_ref, b3_ref,
                w4_ref, b4_ref,
                w5_ref, b5_ref,
                out_ref, *, act_dtype):
    """Fused MLP on one batch tile: 5 x (Linear + ReLU) then a final Linear.

    act_dtype: dtype for the bias-add / ReLU elementwise path
               (bf16 on v6e/v7x, f32 on v5e).
    """
    h = x_ref[...]  # (TB, in_dim) bf16, cast done in the wrapper.

    # Hidden layers: bf16 MXU matmul with f32 accumulation; bias + ReLU in
    # act_dtype; next-layer operand is bf16 (no-op cast when act_dtype==bf16).
    for w_ref, b_ref in ((w0_ref, b0_ref), (w1_ref, b1_ref), (w2_ref, b2_ref),
                         (w3_ref, b3_ref), (w4_ref, b4_ref)):
        z = jnp.dot(h, w_ref[...], preferred_element_type=jnp.float32)
        a = jnp.maximum(z.astype(act_dtype) + b_ref[...], 0.0)
        h = a.astype(jnp.bfloat16)

    # Output layer (columns lane-padded to 128): Linear only, no activation.
    # Lane-dense bf16 store (unmasked vst); wrapper slices & upcasts.
    z = jnp.dot(h, w5_ref[...], preferred_element_type=jnp.float32)
    out_ref[...] = (z.astype(act_dtype) + b5_ref[...]).astype(out_ref.dtype)


def _default_act_dtype():
    """bf16 elementwise on bf16-capable VPUs (v6e/v7x); f32 on v5x."""
    try:
        kind = jax.devices()[0].device_kind.lower()
    except Exception:  # pragma: no cover - defensive
        kind = ""
    if "v5" in kind or "v4" in kind or "v3" in kind or "v2" in kind:
        return jnp.float32
    return jnp.bfloat16


def _pick_batch_tile(batch, max_tile):
    """Choose the per-step batch tile (multiple of 16 rows).

    * Tiny (acting-style) batches: a single tile exactly covering the batch,
      so no wasted MXU rows / writeback.
    * Larger batches: the fewest tiles <= max_tile, but at least 2 balanced
      tiles so the grid can shard across both TensorCores on v7x, with
      minimal padding (e.g. batch=384 -> 2 tiles of 192, not 2 of 256).
    """
    rounded = _round_up(batch, ROW_ALIGN)
    if rounded < 2 * 64:          # too small to be worth splitting
        return rounded
    n_steps = max(2, pl.cdiv(rounded, max_tile))
    return _round_up(pl.cdiv(batch, n_steps), ROW_ALIGN)


def dqn_forward(x, params, *, batch_tile=512, act_dtype=None):
    """Fused DQN forward.

    Args:
      x: (batch, input_dim) array (any float dtype).
      params: list of (W, b) with W: (in, out), b: (1, out) f32 master copies.
      batch_tile: maximum rows per grid step.
      act_dtype: elementwise dtype inside the kernel; None = auto-detect.

    Returns:
      (batch, output_dim) float32 Q-values.
    """
    if act_dtype is None:
        act_dtype = _default_act_dtype()

    batch, in_dim = x.shape
    out_dim = params[-1][0].shape[1]
    out_pad = max(LANE, _round_up(out_dim, LANE))
    n_layers = len(params)

    # Quantize / flatten parameters: weights -> bf16, biases -> act_dtype.
    # Pad the final layer's output dim to a full lane width (zeros) so the
    # kernel's store is lane-dense; the wrapper slices it back afterwards.
    flat = []
    for i, (w, b) in enumerate(params):
        w = w.astype(jnp.bfloat16)
        b = b.reshape(1, -1).astype(act_dtype)
        if i == n_layers - 1 and out_pad != out_dim:
            w = jnp.pad(w, ((0, 0), (0, out_pad - out_dim)))
            b = jnp.pad(b, ((0, 0), (0, out_pad - out_dim)))
        flat.extend([w, b])

    # Adaptive batch tile + padding (input cast to bf16 in the wrapper so the
    # kernel never re-casts and input DMA bytes are halved).
    tb = _pick_batch_tile(batch, batch_tile)
    padded_batch = tb * pl.cdiv(batch, tb)
    x_p = x.astype(jnp.bfloat16)
    if padded_batch != batch:
        x_p = jnp.pad(x_p, ((0, padded_batch - batch), (0, 0)))

    grid = (padded_batch // tb,)

    # x / out tiled along batch; every parameter uses a constant index map so
    # it is DMA'd once and stays VMEM-resident across all grid steps.
    x_spec = pl.BlockSpec((tb, in_dim), lambda i: (i, 0))
    param_specs = [pl.BlockSpec(a.shape, lambda i: (0, 0)) for a in flat]
    out_spec = pl.BlockSpec((tb, out_pad), lambda i: (i, 0))

    out_padded = pl.pallas_call(
        partial(_dqn_kernel, act_dtype=act_dtype),
        out_shape=jax.ShapeDtypeStruct((padded_batch, out_pad), jnp.bfloat16),
        grid=grid,
        in_specs=[x_spec] + param_specs,
        out_specs=out_spec,
        compiler_params=pltpu.CompilerParams(
            dimension_semantics=("parallel",)),
    )(x_p, *flat)

    return out_padded[:batch, :out_dim].astype(jnp.float32)


def init_dqn_params(key, input_dim, output_dim,
                    hidden_dims=(256, 256, 256, 256, 256)):
    """Deterministic init matching the PyTorch module:
       - weights: Xavier (Glorot) normal
       - biases:  PyTorch Linear default, U(-1/sqrt(fan_in), 1/sqrt(fan_in))
    """
    dims = [input_dim] + list(hidden_dims) + [output_dim]
    params = []
    for i in range(len(dims) - 1):
        fan_in, fan_out = dims[i], dims[i + 1]
        key, kw, kb = jax.random.split(key, 3)
        std = math.sqrt(2.0 / (fan_in + fan_out))
        w = std * jax.random.normal(kw, (fan_in, fan_out), dtype=jnp.float32)
        bound = 1.0 / math.sqrt(fan_in)
        b = jax.random.uniform(kb, (1, fan_out), dtype=jnp.float32,
                               minval=-bound, maxval=bound)
        params.append((w, b))
    return params


def dqn_reference_mirrored(x, params, act_dtype):
    """Pure-JAX reference mirroring the kernel's numerics
    (bf16 matmul operands, f32 accumulation, act_dtype bias/ReLU, bf16 store)."""
    h = x.astype(jnp.bfloat16)
    out = None
    for i, (w, b) in enumerate(params):
        z = jnp.dot(h, w.astype(jnp.bfloat16),
                    preferred_element_type=jnp.float32)
        a = z.astype(act_dtype) + b.reshape(1, -1).astype(act_dtype)
        if i < len(params) - 1:
            h = jnp.maximum(a, 0.0).astype(jnp.bfloat16)
        else:
            out = a.astype(jnp.bfloat16)
    return out.astype(jnp.float32)


def dqn_reference_f32(x, params):
    """Full-precision reference matching the original PyTorch module."""
    h = x.astype(jnp.float32)
    for i, (w, b) in enumerate(params):
        h = jnp.dot(h, w) + b.reshape(1, -1)
        if i < len(params) - 1:
            h = jnp.maximum(h, 0.0)
    return h


if __name__ == "__main__":
    key = jax.random.PRNGKey(0)

    input_dim = 16    # small state vector
    output_dim = 4    # 4 discrete actions
    hidden_dims = (256, 256, 256, 256, 256)

    act_dtype = _default_act_dtype()

    key, kparams = jax.random.split(key)
    params = init_dqn_params(kparams, input_dim, output_dim, hidden_dims)

    # 1) Small acting-loop style batch (single exact 16-row tile internally).
    key, kx = jax.random.split(key)
    x_small = jax.random.normal(kx, (2, input_dim), dtype=jnp.float32)
    out_small = jax.block_until_ready(dqn_forward(x_small, params))
    ref_small = dqn_reference_mirrored(x_small, params, act_dtype)
    f32_small = dqn_reference_f32(x_small, params)
    assert out_small.shape == (2, output_dim)
    assert jnp.allclose(out_small, ref_small, atol=2e-2, rtol=2e-2), (
        f"max abs diff {jnp.max(jnp.abs(out_small - ref_small))}")
    assert jnp.allclose(out_small, f32_small, atol=1e-1, rtol=1e-1), (
        f"max abs diff vs f32 {jnp.max(jnp.abs(out_small - f32_small))}")

    # 2) Larger batch: two balanced 192-row tiles (dual-TC shardable), no pad.
    key, kx2 = jax.random.split(key)
    x_big = jax.random.normal(kx2, (384, input_dim), dtype=jnp.float32)
    out_big = jax.block_until_ready(dqn_forward(x_big, params))
    ref_big = dqn_reference_mirrored(x_big, params, act_dtype)
    f32_big = dqn_reference_f32(x_big, params)
    assert out_big.shape == (384, output_dim)
    assert jnp.allclose(out_big, ref_big, atol=2e-2, rtol=2e-2), (
        f"max abs diff {jnp.max(jnp.abs(out_big - ref_big))}")
    assert jnp.allclose(out_big, f32_big, atol=1e-1, rtol=1e-1), (
        f"max abs diff vs f32 {jnp.max(jnp.abs(out_big - f32_big))}")

    # 3) Batch that needs padding and a multi-step grid with the 512-row cap.
    key, kx3 = jax.random.split(key)
    x_odd = jax.random.normal(kx3, (1000, input_dim), dtype=jnp.float32)
    out_odd = jax.block_until_ready(dqn_forward(x_odd, params))
    ref_odd = dqn_reference_mirrored(x_odd, params, act_dtype)
    assert out_odd.shape == (1000, output_dim)
    assert jnp.allclose(out_odd, ref_odd, atol=2e-2, rtol=2e-2), (
        f"max abs diff {jnp.max(jnp.abs(out_odd - ref_odd))}")

    print("KERNEL_OK")
</pallas_src>

<mosaic_0001>
module attributes {stable_mosaic.version = 11 : i64} {
  func.func @_dqn_kernel(%arg0: i32, %arg1: memref<16x16xbf16, #tpu.memory_space<vmem>>, %arg2: memref<16x256xbf16, #tpu.memory_space<vmem>>, %arg3: memref<1x256xbf16, #tpu.memory_space<vmem>>, %arg4: memref<256x256xbf16, #tpu.memory_space<vmem>>, %arg5: memref<1x256xbf16, #tpu.memory_space<vmem>>, %arg6: memref<256x256xbf16, #tpu.memory_space<vmem>>, %arg7: memref<1x256xbf16, #tpu.memory_space<vmem>>, %arg8: memref<256x256xbf16, #tpu.memory_space<vmem>>, %arg9: memref<1x256xbf16, #tpu.memory_space<vmem>>, %arg10: memref<256x256xbf16, #tpu.memory_space<vmem>>, %arg11: memref<1x256xbf16, #tpu.memory_space<vmem>>, %arg12: memref<256x128xbf16, #tpu.memory_space<vmem>>, %arg13: memref<1x128xbf16, #tpu.memory_space<vmem>>, %arg14: memref<16x128xbf16, #tpu.memory_space<vmem>>) attributes {dimension_semantics = [#tpu.dimension_semantics<parallel>], iteration_bounds = array<i64: 1>, scalar_prefetch = 0 : i64, scratch_operands = 0 : i64, tpu.core_type = #tpu.core_type<tc>, window_params = [{transform_indices = @transform_0, window_bounds = array<i64: 16, 16>}, {pipeline_mode = #tpu.pipeline_mode<synchronous>, transform_indices = @transform_1, window_bounds = array<i64: 16, 256>}, {pipeline_mode = #tpu.pipeline_mode<synchronous>, transform_indices = @transform_2, window_bounds = array<i64: 1, 256>}, {pipeline_mode = #tpu.pipeline_mode<synchronous>, transform_indices = @transform_3, window_bounds = array<i64: 256, 256>}, {pipeline_mode = #tpu.pipeline_mode<synchronous>, transform_indices = @transform_4, window_bounds = array<i64: 1, 256>}, {pipeline_mode = #tpu.pipeline_mode<synchronous>, transform_indices = @transform_5, window_bounds = array<i64: 256, 256>}, {pipeline_mode = #tpu.pipeline_mode<synchronous>, transform_indices = @transform_6, window_bounds = array<i64: 1, 256>}, {pipeline_mode = #tpu.pipeline_mode<synchronous>, transform_indices = @transform_7, window_bounds = array<i64: 256, 256>}, {pipeline_mode = #tpu.pipeline_mode<synchronous>, transform_indices = @transform_8, window_bounds = array<i64: 1, 256>}, {pipeline_mode = #tpu.pipeline_mode<synchronous>, transform_indices = @transform_9, window_bounds = array<i64: 256, 256>}, {pipeline_mode = #tpu.pipeline_mode<synchronous>, transform_indices = @transform_10, window_bounds = array<i64: 1, 256>}, {pipeline_mode = #tpu.pipeline_mode<synchronous>, transform_indices = @transform_11, window_bounds = array<i64: 256, 128>}, {pipeline_mode = #tpu.pipeline_mode<synchronous>, transform_indices = @transform_12, window_bounds = array<i64: 1, 128>}, {transform_indices = @transform_13, window_bounds = array<i64: 16, 128>}]} {
    %c0 = arith.constant 0 : index
    %c0_0 = arith.constant 0 : index
    %0 = vector.load %arg1[%c0, %c0_0] : memref<16x16xbf16, #tpu.memory_space<vmem>>, vector<16x16xbf16>
    %c0_1 = arith.constant 0 : index
    %c0_2 = arith.constant 0 : index
    %1 = vector.load %arg2[%c0_1, %c0_2] : memref<16x256xbf16, #tpu.memory_space<vmem>>, vector<16x256xbf16>
    %cst = arith.constant dense<0.000000e+00> : vector<16x256xf32>
    %2 = tpu.matmul %0, %1, %cst {dimension_numbers = #tpu.dot_dimension_numbers<[1], [0], [0], [1], [0, 0, 1, 1], [], []>} : vector<16x16xbf16>, vector<16x256xbf16>, vector<16x256xf32> -> vector<16x256xf32>
    %3 = arith.truncf %2 : vector<16x256xf32> to vector<16x256xbf16>
    %c0_3 = arith.constant 0 : index
    %c0_4 = arith.constant 0 : index
    %4 = vector.load %arg3[%c0_3, %c0_4] : memref<1x256xbf16, #tpu.memory_space<vmem>>, vector<1x256xbf16>
    %5 = vector.broadcast %4 : vector<1x256xbf16> to vector<16x256xbf16>
    %6 = arith.addf %3, %5 : vector<16x256xbf16>
    %cst_5 = arith.constant 0.000000e+00 : bf16
    %7 = vector.broadcast %cst_5 : bf16 to vector<16x256xbf16>
    %8 = arith.maximumf %6, %7 : vector<16x256xbf16>
    %c0_6 = arith.constant 0 : index
    %c0_7 = arith.constant 0 : index
    %9 = vector.load %arg4[%c0_6, %c0_7] : memref<256x256xbf16, #tpu.memory_space<vmem>>, vector<256x256xbf16>
    %cst_8 = arith.constant dense<0.000000e+00> : vector<16x256xf32>
    %10 = tpu.matmul %8, %9, %cst_8 {dimension_numbers = #tpu.dot_dimension_numbers<[1], [0], [0], [1], [0, 0, 1, 1], [], []>} : vector<16x256xbf16>, vector<256x256xbf16>, vector<16x256xf32> -> vector<16x256xf32>
    %11 = arith.truncf %10 : vector<16x256xf32> to vector<16x256xbf16>
    %c0_9 = arith.constant 0 : index
    %c0_10 = arith.constant 0 : index
    %12 = vector.load %arg5[%c0_9, %c0_10] : memref<1x256xbf16, #tpu.memory_space<vmem>>, vector<1x256xbf16>
    %13 = vector.broadcast %12 : vector<1x256xbf16> to vector<16x256xbf16>
    %14 = arith.addf %11, %13 : vector<16x256xbf16>
    %cst_11 = arith.constant 0.000000e+00 : bf16
    %15 = vector.broadcast %cst_11 : bf16 to vector<16x256xbf16>
    %16 = arith.maximumf %14, %15 : vector<16x256xbf16>
    %c0_12 = arith.constant 0 : index
    %c0_13 = arith.constant 0 : index
    %17 = vector.load %arg6[%c0_12, %c0_13] : memref<256x256xbf16, #tpu.memory_space<vmem>>, vector<256x256xbf16>
    %cst_14 = arith.constant dense<0.000000e+00> : vector<16x256xf32>
    %18 = tpu.matmul %16, %17, %cst_14 {dimension_numbers = #tpu.dot_dimension_numbers<[1], [0], [0], [1], [0, 0, 1, 1], [], []>} : vector<16x256xbf16>, vector<256x256xbf16>, vector<16x256xf32> -> vector<16x256xf32>
    %19 = arith.truncf %18 : vector<16x256xf32> to vector<16x256xbf16>
    %c0_15 = arith.constant 0 : index
    %c0_16 = arith.constant 0 : index
    %20 = vector.load %arg7[%c0_15, %c0_16] : memref<1x256xbf16, #tpu.memory_space<vmem>>, vector<1x256xbf16>
    %21 = vector.broadcast %20 : vector<1x256xbf16> to vector<16x256xbf16>
    %22 = arith.addf %19, %21 : vector<16x256xbf16>
    %cst_17 = arith.constant 0.000000e+00 : bf16
    %23 = vector.broadcast %cst_17 : bf16 to vector<16x256xbf16>
    %24 = arith.maximumf %22, %23 : vector<16x256xbf16>
    %c0_18 = arith.constant 0 : index
    %c0_19 = arith.constant 0 : index
    %25 = vector.load %arg8[%c0_18, %c0_19] : memref<256x256xbf16, #tpu.memory_space<vmem>>, vector<256x256xbf16>
    %cst_20 = arith.constant dense<0.000000e+00> : vector<16x256xf32>
    %26 = tpu.matmul %24, %25, %cst_20 {dimension_numbers = #tpu.dot_dimension_numbers<[1], [0], [0], [1], [0, 0, 1, 1], [], []>} : vector<16x256xbf16>, vector<256x256xbf16>, vector<16x256xf32> -> vector<16x256xf32>
    %27 = arith.truncf %26 : vector<16x256xf32> to vector<16x256xbf16>
    %c0_21 = arith.constant 0 : index
    %c0_22 = arith.constant 0 : index
    %28 = vector.load %arg9[%c0_21, %c0_22] : memref<1x256xbf16, #tpu.memory_space<vmem>>, vector<1x256xbf16>
    %29 = vector.broadcast %28 : vector<1x256xbf16> to vector<16x256xbf16>
    %30 = arith.addf %27, %29 : vector<16x256xbf16>
    %cst_23 = arith.constant 0.000000e+00 : bf16
    %31 = vector.broadcast %cst_23 : bf16 to vector<16x256xbf16>
    %32 = arith.maximumf %30, %31 : vector<16x256xbf16>
    %c0_24 = arith.constant 0 : index
    %c0_25 = arith.constant 0 : index
    %33 = vector.load %arg10[%c0_24, %c0_25] : memref<256x256xbf16, #tpu.memory_space<vmem>>, vector<256x256xbf16>
    %cst_26 = arith.constant dense<0.000000e+00> : vector<16x256xf32>
    %34 = tpu.matmul %32, %33, %cst_26 {dimension_numbers = #tpu.dot_dimension_numbers<[1], [0], [0], [1], [0, 0, 1, 1], [], []>} : vector<16x256xbf16>, vector<256x256xbf16>, vector<16x256xf32> -> vector<16x256xf32>
    %35 = arith.truncf %34 : vector<16x256xf32> to vector<16x256xbf16>
    %c0_27 = arith.constant 0 : index
    %c0_28 = arith.constant 0 : index
    %36 = vector.load %arg11[%c0_27, %c0_28] : memref<1x256xbf16, #tpu.memory_space<vmem>>, vector<1x256xbf16>
    %37 = vector.broadcast %36 : vector<1x256xbf16> to vector<16x256xbf16>
    %38 = arith.addf %35, %37 : vector<16x256xbf16>
    %cst_29 = arith.constant 0.000000e+00 : bf16
    %39 = vector.broadcast %cst_29 : bf16 to vector<16x256xbf16>
    %40 = arith.maximumf %38, %39 : vector<16x256xbf16>
    %c0_30 = arith.constant 0 : index
    %c0_31 = arith.constant 0 : index
    %41 = vector.load %arg12[%c0_30, %c0_31] : memref<256x128xbf16, #tpu.memory_space<vmem>>, vector<256x128xbf16>
    %cst_32 = arith.constant dense<0.000000e+00> : vector<16x128xf32>
    %42 = tpu.matmul %40, %41, %cst_32 {dimension_numbers = #tpu.dot_dimension_numbers<[1], [0], [0], [1], [0, 0, 1, 1], [], []>} : vector<16x256xbf16>, vector<256x128xbf16>, vector<16x128xf32> -> vector<16x128xf32>
    %43 = arith.truncf %42 : vector<16x128xf32> to vector<16x128xbf16>
    %c0_33 = arith.constant 0 : index
    %c0_34 = arith.constant 0 : index
    %44 = vector.load %arg13[%c0_33, %c0_34] : memref<1x128xbf16, #tpu.memory_space<vmem>>, vector<1x128xbf16>
    %45 = vector.broadcast %44 : vector<1x128xbf16> to vector<16x128xbf16>
    %46 = arith.addf %43, %45 : vector<16x128xbf16>
    %c0_35 = arith.constant 0 : index
    %c0_36 = arith.constant 0 : index
    %47 = vector.load %arg14[%c0_35, %c0_36] : memref<16x128xbf16, #tpu.memory_space<vmem>>, vector<16x128xbf16>
    tpu.vector_store %arg14[%c0_35, %c0_36], %46 {strides = array<i32>} : memref<16x128xbf16, #tpu.memory_space<vmem>>, vector<16x128xbf16>,
    return
  }
  func.func @transform_0(%arg0: i32) -> (i32, i32) {
    %c0_i32 = arith.constant 0 : i32
    %c0_i32_0 = arith.constant 0 : i32
    return %arg0, %c0_i32 : i32, i32
  }
  func.func @transform_1(%arg0: i32) -> (i32, i32) {
    %c0_i32 = arith.constant 0 : i32
    %c0_i32_0 = arith.constant 0 : i32
    %c0_i32_1 = arith.constant 0 : i32
    return %c0_i32, %c0_i32_0 : i32, i32
  }
  func.func @transform_2(%arg0: i32) -> (i32, i32) {
    %c0_i32 = arith.constant 0 : i32
    %c0_i32_0 = arith.constant 0 : i32
    %c0_i32_1 = arith.constant 0 : i32
    return %c0_i32, %c0_i32_0 : i32, i32
  }
  func.func @transform_3(%arg0: i32) -> (i32, i32) {
    %c0_i32 = arith.constant 0 : i32
    %c0_i32_0 = arith.constant 0 : i32
    %c0_i32_1 = arith.constant 0 : i32
    return %c0_i32, %c0_i32_0 : i32, i32
  }
  func.func @transform_4(%arg0: i32) -> (i32, i32) {
    %c0_i32 = arith.constant 0 : i32
    %c0_i32_0 = arith.constant 0 : i32
    %c0_i32_1 = arith.constant 0 : i32
    return %c0_i32, %c0_i32_0 : i32, i32
  }
  func.func @transform_5(%arg0: i32) -> (i32, i32) {
    %c0_i32 = arith.constant 0 : i32
    %c0_i32_0 = arith.constant 0 : i32
    %c0_i32_1 = arith.constant 0 : i32
    return %c0_i32, %c0_i32_0 : i32, i32
  }
  func.func @transform_6(%arg0: i32) -> (i32, i32) {
    %c0_i32 = arith.constant 0 : i32
    %c0_i32_0 = arith.constant 0 : i32
    %c0_i32_1 = arith.constant 0 : i32
    return %c0_i32, %c0_i32_0 : i32, i32
  }
  func.func @transform_7(%arg0: i32) -> (i32, i32) {
    %c0_i32 = arith.constant 0 : i32
    %c0_i32_0 = arith.constant 0 : i32
    %c0_i32_1 = arith.constant 0 : i32
    return %c0_i32, %c0_i32_0 : i32, i32
  }
  func.func @transform_8(%arg0: i32) -> (i32, i32) {
    %c0_i32 = arith.constant 0 : i32
    %c0_i32_0 = arith.constant 0 : i32
    %c0_i32_1 = arith.constant 0 : i32
    return %c0_i32, %c0_i32_0 : i32, i32
  }
  func.func @transform_9(%arg0: i32) -> (i32, i32) {
    %c0_i32 = arith.constant 0 : i32
    %c0_i32_0 = arith.constant 0 : i32
    %c0_i32_1 = arith.constant 0 : i32
    return %c0_i32, %c0_i32_0 : i32, i32
  }
  func.func @transform_10(%arg0: i32) -> (i32, i32) {
    %c0_i32 = arith.constant 0 : i32
    %c0_i32_0 = arith.constant 0 : i32
    %c0_i32_1 = arith.constant 0 : i32
    return %c0_i32, %c0_i32_0 : i32, i32
  }
  func.func @transform_11(%arg0: i32) -> (i32, i32) {
    %c0_i32 = arith.constant 0 : i32
    %c0_i32_0 = arith.constant 0 : i32
    %c0_i32_1 = arith.constant 0 : i32
    return %c0_i32, %c0_i32_0 : i32, i32
  }
  func.func @transform_12(%arg0: i32) -> (i32, i32) {
    %c0_i32 = arith.constant 0 : i32
    %c0_i32_0 = arith.constant 0 : i32
    %c0_i32_1 = arith.constant 0 : i32
    return %c0_i32, %c0_i32_0 : i32, i32
  }
  func.func @transform_13(%arg0: i32) -> (i32, i32) {
    %c0_i32 = arith.constant 0 : i32
    %c0_i32_0 = arith.constant 0 : i32
    return %arg0, %c0_i32 : i32, i32
  }
}

</mosaic_0001>

<bundles_post_ra>
// kernel: tpu_custom_call.1
= control target key start
LH: loop header
LB: loop body
LE: loop exit
PB: predicated region body
PF: predicated region fallthrough
CT: control target
= control target key end

     0   :  { %18 = vsyncpa [#allocation3], 0  ;;  %s2429_s0 = inlined_call_operand.hbm [shape: bf16[16,16], index: 0, kind: input, shape index: {}]   ;;  %s2430_s1 = inlined_call_operand.hbm [shape: bf16[16,256], index: 1, kind: input, shape index: {}]   ;;  %s2431_s2 = inlined_call_operand.vmem [shape: bf16[1,256], index: 2, kind: input, shape index: {}]   ;;  %s2432_s3 = inlined_call_operand.hbm [shape: bf16[256,256], index: 3, kind: input, shape index: {}]   ;;  %s2433_s4 = inlined_call_operand.vmem [shape: bf16[1,256], index: 4, kind: input, shape index: {}]   ;;  %s2434_s5 = inlined_call_operand.hbm [shape: bf16[256,256], index: 5, kind: input, shape index: {}]   ;;  %s2435_s6 = inlined_call_operand.vmem [shape: bf16[1,256], index: 6, kind: input, shape index: {}]   ;;  %s2436_s7 = inlined_call_operand.hbm [shape: bf16[256,256], index: 7, kind: input, shape index: {}]   ;;  %s2437_s8 = inlined_call_operand.vmem [shape: bf16[1,256], index: 8, kind: input, shape index: {}]   ;;  %s2438_s9 = inlined_call_operand.hbm [shape: bf16[256,256], index: 9, kind: input, shape index: {}]   ;;  %s2439_s10 = inlined_call_operand.vmem [shape: bf16[1,256], index: 10, kind: input, shape index: {}]   ;;  %s2440_s11 = inlined_call_operand.hbm [shape: bf16[256,128], index: 11, kind: input, shape index: {}]   ;;  %s2441_s12 = inlined_call_operand.vmem [shape: bf16[1,128], index: 12, kind: input, shape index: {}]   ;;  %s2442_s13 = inlined_call_operand.hbm [shape: bf16[16,128], index: 13, kind: output, shape index: {}]  }
   0x1   :  { %19 = vsyncpa [#allocation6], 0 }
   0x2   :  { %20 = vsyncpa [#allocation9], 0 }
   0x3   :  { %21 = vsyncpa [#allocation12], 0 }
   0x4   :  { %22 = vsyncpa [#allocation4], 0  ;;  %s2164_s25 = smov [#allocation5]   ;;  %s1978_s29 = scalar_lea.hbm %s2430_s1, 256 }
   0x5   :  { %s40_s26 = sshll.u32 %s2164_s25, 4  ;;  %p1979_p0 = scmp.ne.s32.totalorder %s2430_s1, %s1978_s29  ;;  %s41_s26 = int_to_ptr.vmem [resolvable:$true] %s40_s26 }
   0x6   :  { %p1982_p1 = scmp.lt.u32.totalorder %s1978_s29, %s2430_s1 }
   0x8   :  { %p1984_p2 = pnand %p1982_p1, %p1979_p0 }
   0xa   :  { %1987 = shalt.err (!%p1984_p2)
}
   0xb   :  { %s1988_s17 = scalar_lea.vmem %s41_s26, 256  ;;  %p1993_p4 = scmp.lt.s32.totalorder %s41_s26, %s41_s26 }
   0xc   :  { %p1989_p3 = scmp.ne.s32.totalorder %s41_s26, %s1988_s17  ;;  %p1994_p5 = scmp.lt.s32.totalorder %s1988_s17, %s1988_s17 }
   0xe   :  { %p1995_p6 = por %p1994_p5, %p1993_p4 }
  0x10   :  { %p1996_p7 = pnand %p1995_p6, %p1989_p3 }
  0x12   :  { %1999 = shalt.err (!%p1996_p7)
}
  0x13   :  { %s2165_s18 = smov 128   ;;  %s2166_s19 = smov 8  }
  0x14   :  { %46 = dma.hbm_to_vmem [thread:$0]  %s2430_s1, 256, %s41_s26, [#allocation6], %s2165_s18, %s2165_s18, %s2166_s19  }
  0x15   :  { %s2167_s22 = smov [#allocation8]   ;;  %s2168_s24 = smov [#allocation11]  }
  0x16   :  { %s68_s23 = sshll.u32 %s2167_s22, 4  ;;  %s96_s25 = sshll.u32 %s2168_s24, 4  ;;  %s69_s23 = int_to_ptr.vmem [resolvable:$true] %s68_s23  ;;  %s97_s25 = int_to_ptr.vmem [resolvable:$true] %s96_s25 }
  0x17   :  { %s2000_s29 = scalar_lea.hbm %s2434_s5, 4096 }
  0x18   :  { %p2001_p8 = scmp.ne.s32.totalorder %s2434_s5, %s2000_s29  ;;  %p2004_p9 = scmp.lt.u32.totalorder %s2000_s29, %s2434_s5 }
  0x1a   :  { %p2006_p10 = pnand %p2004_p9, %p2001_p8 }
  0x1c   :  { %2009 = shalt.err (!%p2006_p10)
}
  0x1d   :  { %s2010_s1 = scalar_lea.vmem %s69_s23, 4096  ;;  %p2015_p12 = scmp.lt.s32.totalorder %s69_s23, %s69_s23 }
  0x1e   :  { %p2011_p11 = scmp.ne.s32.totalorder %s69_s23, %s2010_s1  ;;  %p2016_p13 = scmp.lt.s32.totalorder %s2010_s1, %s2010_s1 }
  0x20   :  { %p2017_p0 = por %p2016_p13, %p2015_p12 }
  0x22   :  { %p2018_p1 = pnand %p2017_p0, %p2011_p11 }
  0x24   :  { %2021 = shalt.err (!%p2018_p1)
}
  0x25   :  { %74 = dma.hbm_to_vmem [thread:$0]  %s2434_s5, 4096, %s69_s23, [#allocation9], %s2165_s18, %s2165_s18, %s2166_s19  }
  0x26   :  { %s2022_s22 = scalar_lea.hbm %s2438_s9, 4096 }
  0x27   :  { %p2023_p2 = scmp.ne.s32.totalorder %s2438_s9, %s2022_s22  ;;  %p2026_p3 = scmp.lt.u32.totalorder %s2022_s22, %s2438_s9 }
  0x29   :  { %p2028_p4 = pnand %p2026_p3, %p2023_p2 }
  0x2b   :  { %2031 = shalt.err (!%p2028_p4)
}
  0x2c   :  { %s2032_s30 = scalar_lea.vmem %s97_s25, 4096  ;;  %p2037_p6 = scmp.lt.s32.totalorder %s97_s25, %s97_s25 }
  0x2d   :  { %p2033_p5 = scmp.ne.s32.totalorder %s97_s25, %s2032_s30  ;;  %p2038_p7 = scmp.lt.s32.totalorder %s2032_s30, %s2032_s30 }
  0x2f   :  { %p2039_p8 = por %p2038_p7, %p2037_p6 }
  0x31   :  { %p2040_p9 = pnand %p2039_p8, %p2033_p5 }
  0x33   :  { %2043 = shalt.err (!%p2040_p9)
}
  0x34   :  { %102 = dma.hbm_to_vmem [thread:$0]  %s2438_s9, 4096, %s97_s25, [#allocation12], %s2165_s18, %s2165_s18, %s2166_s19  }
  0x35   :  { %s2169_s14 = smov [#allocation2]   ;;  %s2044_s26 = scalar_lea.hbm %s2429_s0, 128 }
  0x36   :  { %s28_s15 = sshll.u32 %s2169_s14, 4  ;;  %p2045_p10 = scmp.ne.s32.totalorder %s2429_s0, %s2044_s26  ;;  %s29_s15 = int_to_ptr.vmem [resolvable:$true] %s28_s15 }
  0x37   :  { %p2048_p11 = scmp.lt.u32.totalorder %s2044_s26, %s2429_s0 }
  0x39   :  { %p2050_p12 = pnand %p2048_p11, %p2045_p10 }
  0x3b   :  { %2053 = shalt.err (!%p2050_p12)
}
  0x3c   :  { %s2054_s24 = scalar_lea.vmem %s29_s15, 128  ;;  %p2059_p0 = scmp.lt.s32.totalorder %s29_s15, %s29_s15 }
  0x3d   :  { %p2055_p13 = scmp.ne.s32.totalorder %s29_s15, %s2054_s24  ;;  %p2060_p1 = scmp.lt.s32.totalorder %s2054_s24, %s2054_s24 }
  0x3f   :  { %p2061_p2 = por %p2060_p1, %p2059_p0 }
  0x41   :  { %p2062_p3 = pnand %p2061_p2, %p2055_p13 }
  0x43   :  { %2065 = shalt.err (!%p2062_p3)
}
  0x44   :  { %s2170_s9 = smov 64   ;;  %s2171_s25 = smov 4  }
  0x45   :  { %34 = dma.hbm_to_vmem [thread:$0]  %s2429_s0, 128, %s29_s15, [#allocation3], %s2170_s9, %s2170_s9, %s2171_s25  }
  0x46   :  { %s2172_s29 = smov [#allocation7]   ;;  %s2173_s5 = smov [#allocation10]  }
  0x47   :  { %s54_s30 = sshll.u32 %s2172_s29, 4  ;;  %s82_s23 = sshll.u32 %s2173_s5, 4  ;;  %s55_s30 = int_to_ptr.vmem [resolvable:$true] %s54_s30  ;;  %s2308_s23 = int_to_ptr.vmem [resolvable:$true] %s82_s23 }
  0x48   :  { %s2066_s1 = scalar_lea.hbm %s2432_s3, 4096 }
  0x49   :  { %p2067_p4 = scmp.ne.s32.totalorder %s2432_s3, %s2066_s1  ;;  %p2070_p5 = scmp.lt.u32.totalorder %s2066_s1, %s2432_s3 }
  0x4b   :  { %p2072_p6 = pnand %p2070_p5, %p2067_p4 }
  0x4d   :  { %2075 = shalt.err (!%p2072_p6)
}
  0x4e   :  { %s2076_s0 = scalar_lea.vmem %s55_s30, 4096  ;;  %p2081_p8 = scmp.lt.s32.totalorder %s55_s30, %s55_s30 }
  0x4f   :  { %p2077_p7 = scmp.ne.s32.totalorder %s55_s30, %s2076_s0  ;;  %p2082_p9 = scmp.lt.s32.totalorder %s2076_s0, %s2076_s0 }
  0x51   :  { %p2083_p10 = por %p2082_p9, %p2081_p8 }
  0x53   :  { %p2084_p11 = pnand %p2083_p10, %p2077_p7 }
  0x55   :  { %2087 = shalt.err (!%p2084_p11)
}
  0x56   :  { %60 = dma.hbm_to_vmem [thread:$0]  %s2432_s3, 4096, %s55_s30, [#allocation6], %s2165_s18, %s2165_s18, %s2166_s19  }
  0x57   :  { %s2088_s28 = scalar_lea.hbm %s2436_s7, 4096 }
  0x58   :  { %p2089_p12 = scmp.ne.s32.totalorder %s2436_s7, %s2088_s28  ;;  %p2092_p13 = scmp.lt.u32.totalorder %s2088_s28, %s2436_s7 }
  0x5a   :  { %p2094_p0 = pnand %p2092_p13, %p2089_p12 }
  0x5c   :  { %2097 = shalt.err (!%p2094_p0)
}
  0x5d   :  { %s2098_s1 = scalar_lea.vmem %s2308_s23, 4096  ;;  %p2103_p2 = scmp.lt.s32.totalorder %s2308_s23, %s2308_s23 }
  0x5e   :  { %p2099_p1 = scmp.ne.s32.totalorder %s2308_s23, %s2098_s1  ;;  %p2104_p3 = scmp.lt.s32.totalorder %s2098_s1, %s2098_s1 }
  0x60   :  { %p2105_p4 = por %p2104_p3, %p2103_p2 }
  0x62   :  { %p2106_p5 = pnand %p2105_p4, %p2099_p1 }
  0x64   :  { %2109 = shalt.err (!%p2106_p5)
}
  0x65   :  { %88 = dma.hbm_to_vmem [thread:$0]  %s2436_s7, 4096, %s2308_s23, [#allocation9], %s2165_s18, %s2165_s18, %s2166_s19  }
  0x66   :  { %s2174_s26 = smov [#allocation13]   ;;  %s2110_s0 = scalar_lea.hbm %s2440_s11, 2048 }
  0x67   :  { %s110_s17 = sshll.u32 %s2174_s26, 4  ;;  %p2111_p6 = scmp.ne.s32.totalorder %s2440_s11, %s2110_s0  ;;  %s111_s17 = int_to_ptr.vmem [resolvable:$true] %s110_s17 }
  0x68   :  { %p2114_p7 = scmp.lt.u32.totalorder %s2110_s0, %s2440_s11 }
  0x6a   :  { %p2116_p8 = pnand %p2114_p7, %p2111_p6 }
  0x6c   :  { %2119 = shalt.err (!%p2116_p8)
}
  0x6d   :  { %s2120_s28 = scalar_lea.vmem %s111_s17, 2048  ;;  %p2125_p10 = scmp.lt.s32.totalorder %s111_s17, %s111_s17 }
  0x6e   :  { %p2121_p9 = scmp.ne.s32.totalorder %s111_s17, %s2120_s28  ;;  %p2126_p11 = scmp.lt.s32.totalorder %s2120_s28, %s2120_s28 }
  0x70   :  { %p2127_p12 = por %p2126_p11, %p2125_p10 }
  0x72   :  { %p2128_p13 = pnand %p2127_p12, %p2121_p9 }
  0x74   :  { %2131 = shalt.err (!%p2128_p13)
}
  0x75   :  { %116 = dma.hbm_to_vmem [thread:$0]  %s2440_s11, 2048, %s111_s17, [#allocation12], %s2170_s9, %s2170_s9, %s2171_s25  }
  0x76   :  { %2154 = dma.done.wait [#allocation3], 128  }
  0x77   :  { %2155 = vsyncadd [#allocation3], 4294967168 }
  0x78   :  { %2156 = dma.done.wait [#allocation6], 4352  }
  0x79   :  { %2157 = vsyncadd [#allocation6], 4294962944 }
  0x7a   :  { %2158 = dma.done.wait [#allocation9], 8192  }
  0x7b   :  { %2159 = vsyncadd [#allocation9], 4294959104 }
  0x7c   :  { %2160 = dma.done.wait [#allocation12], 6144  }
  0x7d   :  { %2161 = vsyncadd [#allocation12], 4294961152  ;;  %v2175_v0 = vmov 0   ;;  %v1766_v1 = vld [vmem:[#allocation5 + $0x4] ss:$8 sps:$4 sm:$0xff]   ;;  %v1769_v3 = vld [vmem:[#allocation2] sm:$0xff]  }
  0x7e   :  { %196 = vmatprep.mubr.bf16.mxu0 %v2175_v0  ;;  %v1768_v2 = vld [vmem:[#allocation5] ss:$8 sps:$4 sm:$0xff]   ;;  %164 = vmatprep.subr.bf16.mxu0 %v1766_v1  ;;  %vm160_vm0 = vcmask 130048   ;;  %v1770_v4 = vld [vmem:[#allocation7 + $0x4] ss:$8 sps:$4 sm:$0xff]   ;;  %s2177_s1 = smov [#allocation14]  }
  0x7f   :  { %165 = vmatpush1.bf16.msra.mxu0 %v1768_v2  ;;  %v1772_v5 = vld [vmem:[#allocation7] ss:$8 sps:$4 sm:$0xff]   ;;  %v1773_v6 = vld [vmem:[#allocation7 + $0x14] ss:$8 sps:$4 sm:$0xff]   ;;  %443 = vmatprep.subr.bf16.mxu1 %v1770_v4  ;;  %v1775_v7 = vld [vmem:[#allocation7 + $0x10] ss:$8 sps:$4 sm:$0xff]  }
  0x80   :  { %444 = vmatpush1.bf16.msra.mxu1 %v1772_v5  ;;  %v1776_v8 = vld [vmem:[#allocation7 + $0x24] ss:$8 sps:$4 sm:$0xff]   ;;  %v1778_v9 = vld [vmem:[#allocation7 + $0x20] ss:$8 sps:$4 sm:$0xff]   ;;  %v1779_v10 = vld [vmem:[#allocation7 + $0x34] ss:$8 sps:$4 sm:$0xff]  }
  0x81   :  { %445 = vmatprep.subr.bf16.mxu1 %v1773_v6  ;;  %v1781_v11 = vld [vmem:[#allocation7 + $0x30] ss:$8 sps:$4 sm:$0xff]   ;;  %v1782_v12 = vld [vmem:[#allocation7 + $0x44] ss:$8 sps:$4 sm:$0xff]   ;;  %v1784_v13 = vld [vmem:[#allocation7 + $0x40] ss:$8 sps:$4 sm:$0xff]  }
  0x82   :  { %1578 = vmatmul.mubr.msk.bf16.vlgmr.msra.gmra.mrb[0].mxu0 %vm160_vm0, %v1769_v3  ;;  %v1785_v14 = vld [vmem:[#allocation7 + $0x54] ss:$8 sps:$4 sm:$0xff]   ;;  %v1787_v15 = vld [vmem:[#allocation7 + $0x50] ss:$8 sps:$4 sm:$0xff]   ;;  %v1788_v16 = vld [vmem:[#allocation7 + $0x64] ss:$8 sps:$4 sm:$0xff]   ;;  %v222_v3 = vlaneseq }
  0x83   :  { %v1790_v17 = vld [vmem:[#allocation7 + $0x60] ss:$8 sps:$4 sm:$0xff]   ;;  %v1791_v18 = vld [vmem:[#allocation7 + $0x74] ss:$8 sps:$4 sm:$0xff]   ;;  %v1793_v19 = vld [vmem:[#allocation7 + $0x70] ss:$8 sps:$4 sm:$0xff]  }
  0x84   :  { %446 = vmatpush1.bf16.msra.mxu1 %v1775_v7  ;;  %v1794_v20 = vld [vmem:[#allocation7 + $0x84] ss:$8 sps:$4 sm:$0xff]   ;;  %v1796_v21 = vld [vmem:[#allocation7 + $0x80] ss:$8 sps:$4 sm:$0xff]   ;;  %v1797_v22 = vld [vmem:[#allocation7 + $0x94] ss:$8 sps:$4 sm:$0xff]  }
  0x85   :  { %447 = vmatprep.subr.bf16.mxu1 %v1776_v8  ;;  %v1799_v23 = vld [vmem:[#allocation7 + $0x90] ss:$8 sps:$4 sm:$0xff]   ;;  %v1800_v24 = vld [vmem:[#allocation7 + $0xa4] ss:$8 sps:$4 sm:$0xff]   ;;  %v1802_v25 = vld [vmem:[#allocation7 + $0xa0] ss:$8 sps:$4 sm:$0xff]  }
  0x86   :  { %v1803_v26 = vld [vmem:[#allocation7 + $0xb4] ss:$8 sps:$4 sm:$0xff]   ;;  %v1805_v27 = vld [vmem:[#allocation7 + $0xb0] ss:$8 sps:$4 sm:$0xff]   ;;  %v1806_v28 = vld [vmem:[#allocation7 + $0xc4] ss:$8 sps:$4 sm:$0xff]  }
  0x87   :  { %v1808_v29 = vld [vmem:[#allocation7 + $0xc0] ss:$8 sps:$4 sm:$0xff]   ;;  %v1809_v30 = vld [vmem:[#allocation7 + $0xd4] ss:$8 sps:$4 sm:$0xff]   ;;  %v1811_v31 = vld [vmem:[#allocation7 + $0xd0] ss:$8 sps:$4 sm:$0xff]  }
  0x88   :  { %448 = vmatpush1.bf16.msra.mxu1 %v1778_v9  ;;  %v1812_v32 = vld [vmem:[#allocation7 + $0xe4] ss:$8 sps:$4 sm:$0xff]   ;;  %v1814_v33 = vld [vmem:[#allocation7 + $0xe0] ss:$8 sps:$4 sm:$0xff]   ;;  %v1815_v34 = vld [vmem:[#allocation7 + $0xf4] ss:$8 sps:$4 sm:$0xff]  }
  0x89   :  { %449 = vmatprep.subr.bf16.mxu1 %v1779_v10  ;;  %v1817_v35 = vld [vmem:[#allocation7 + $0xf0] ss:$8 sps:$4 sm:$0xff]   ;;  %v1818_v36 = vld [vmem:[#allocation8] ss:$8 sps:$4 sm:$0xff]   ;;  %v1820_v37 = vld [vmem:[#allocation8 + $0x4] ss:$8 sps:$4 sm:$0xff]  }
  0x8a   :  { %v1823_v38 = vld [vmem:[#allocation8 + $0x14] ss:$8 sps:$4 sm:$0xff]   ;;  %722 = vmatprep.subr.bf16.mxu0 %v1820_v37  ;;  %v1821_v39 = vld [vmem:[#allocation8 + $0x10] ss:$8 sps:$4 sm:$0xff]   ;;  %v1826_v40 = vld [vmem:[#allocation8 + $0x24] ss:$8 sps:$4 sm:$0xff]  }
  0x8b   :  { %723 = vmatpush1.bf16.msra.mxu0 %v1818_v36  ;;  %v1824_v41 = vld [vmem:[#allocation8 + $0x20] ss:$8 sps:$4 sm:$0xff]   ;;  %v1829_v42 = vld [vmem:[#allocation8 + $0x34] ss:$8 sps:$4 sm:$0xff]   ;;  %v1827_v43 = vld [vmem:[#allocation8 + $0x30] ss:$8 sps:$4 sm:$0xff]  }
  0x8c   :  { %450 = vmatpush1.bf16.msra.mxu1 %v1781_v11  ;;  %724 = vmatprep.subr.bf16.mxu0 %v1823_v38  ;;  %v1832_v44 = vld [vmem:[#allocation8 + $0x44] ss:$8 sps:$4 sm:$0xff]   ;;  %v1830_v45 = vld [vmem:[#allocation8 + $0x40] ss:$8 sps:$4 sm:$0xff]   ;;  %v1835_v46 = vld [vmem:[#allocation8 + $0x54] ss:$8 sps:$4 sm:$0xff]  }
  0x8d   :  { %451 = vmatprep.subr.bf16.mxu1 %v1782_v12  ;;  %v1833_v47 = vld [vmem:[#allocation8 + $0x50] ss:$8 sps:$4 sm:$0xff]   ;;  %v1838_v48 = vld [vmem:[#allocation8 + $0x64] ss:$8 sps:$4 sm:$0xff]   ;;  %v1836_v49 = vld [vmem:[#allocation8 + $0x60] ss:$8 sps:$4 sm:$0xff]  }
  0x8e   :  { %v1841_v50 = vld [vmem:[#allocation8 + $0x74] ss:$8 sps:$4 sm:$0xff]   ;;  %v1839_v51 = vld [vmem:[#allocation8 + $0x70] ss:$8 sps:$4 sm:$0xff]   ;;  %v1844_v52 = vld [vmem:[#allocation8 + $0x84] ss:$8 sps:$4 sm:$0xff]  }
  0x8f   :  { %725 = vmatpush1.bf16.msra.mxu0 %v1821_v39  ;;  %v1842_v53 = vld [vmem:[#allocation8 + $0x80] ss:$8 sps:$4 sm:$0xff]   ;;  %v1847_v54 = vld [vmem:[#allocation8 + $0x94] ss:$8 sps:$4 sm:$0xff]   ;;  %v1845_v55 = vld [vmem:[#allocation8 + $0x90] ss:$8 sps:$4 sm:$0xff]  }
  0x90   :  { %452 = vmatpush1.bf16.msra.mxu1 %v1784_v13  ;;  %726 = vmatprep.subr.bf16.mxu0 %v1826_v40  ;;  %v1850_v56 = vld [vmem:[#allocation8 + $0xa4] ss:$8 sps:$4 sm:$0xff]   ;;  %v1848_v57 = vld [vmem:[#allocation8 + $0xa0] ss:$8 sps:$4 sm:$0xff]   ;;  %v1853_v58 = vld [vmem:[#allocation8 + $0xb4] ss:$8 sps:$4 sm:$0xff]  }
  0x91   :  { %453 = vmatprep.subr.bf16.mxu1 %v1785_v14  ;;  %v1851_v59 = vld [vmem:[#allocation8 + $0xb0] ss:$8 sps:$4 sm:$0xff]   ;;  %v1856_v60 = vld [vmem:[#allocation8 + $0xc4] ss:$8 sps:$4 sm:$0xff]   ;;  %v1854_v61 = vld [vmem:[#allocation8 + $0xc0] ss:$8 sps:$4 sm:$0xff]  }
  0x92   :  { %v1859_v62 = vld [vmem:[#allocation8 + $0xd4] ss:$8 sps:$4 sm:$0xff]   ;;  %v1857_v63 = vld [vmem:[#allocation8 + $0xd0] ss:$8 sps:$4 sm:$0xff]   ;;  %v2176_v1 = vmov 1966171168  }
  0x93   :  { %727 = vmatpush1.bf16.msra.mxu0 %v1824_v41  ;;  %v220_v2 = vunpack.c.l.s4 %v2176_v1  ;;  %v223_v5 = vshrl.u32 %v222_v3, 7  ;;  %v1579_v6 = vld.sshfl [vmem:[%s2431_s2] sm:$0x11 pattern:$0x75316420]  ;;  %s1560_s3 = sshll.u32 %s2177_s1, 4  ;;  %s1561_s3 = int_to_ptr.vmem [resolvable:$true] %s1560_s3 }
  0x94   :  { %454 = vmatpush1.bf16.msra.mxu1 %v1787_v15  ;;  %728 = vmatprep.subr.bf16.mxu0 %v1829_v42  ;;  %v218_v8 = vcombine.high %v1579_v6, %v1579_v6  ;;  %v1877_v36 = vld [vmem:[#allocation10 + $0x34] ss:$8 sps:$4 sm:$0xff]   ;;  %v1875_v37 = vld [vmem:[#allocation10 + $0x30] ss:$8 sps:$4 sm:$0xff]   ;;  %v1880_v38 = vld [vmem:[#allocation10 + $0x44] ss:$8 sps:$4 sm:$0xff]   ;;  %p2137_p1 = scmp.lt.s32.totalorder %s1561_s3, %s1561_s3 }
  0x95   :  { %455 = vmatprep.subr.bf16.mxu1 %v1788_v16  ;;  %v221_v4 = vunpack.c.0.s8 %v220_v2  ;;  %v2368_v12 = vsub.s32 0, %v223_v5  ;;  %v1878_v39 = vld [vmem:[#allocation10 + $0x40] ss:$8 sps:$4 sm:$0xff]   ;;  %v1883_v40 = vld [vmem:[#allocation10 + $0x54] ss:$8 sps:$4 sm:$0xff]   ;;  %s2132_s30 = scalar_lea.vmem %s1561_s3, 128 }
  0x96   :  { %v1881_v41 = vld [vmem:[#allocation10 + $0x50] ss:$8 sps:$4 sm:$0xff]   ;;  %v1886_v42 = vld [vmem:[#allocation10 + $0x64] ss:$8 sps:$4 sm:$0xff]   ;;  %p2133_p0 = scmp.ne.s32.totalorder %s1561_s3, %s2132_s30  ;;  %p2138_p2 = scmp.lt.s32.totalorder %s2132_s30, %s2132_s30 }
  0x97   :  { %729 = vmatpush1.bf16.msra.mxu0 %v1827_v43  ;;  %v2364_v7 = vsub.s32 %v221_v4, %v223_v5  ;;  %v1884_v43 = vld [vmem:[#allocation10 + $0x60] ss:$8 sps:$4 sm:$0xff]  }
  0x98   :  { %456 = vmatpush1.bf16.msra.mxu1 %v1790_v17  ;;  %730 = vmatprep.subr.bf16.mxu0 %v1832_v44  ;;  %v1889_v44 = vld [vmem:[#allocation10 + $0x74] ss:$8 sps:$4 sm:$0xff]   ;;  %p2139_p3 = por %p2138_p2, %p2137_p1 }
  0x99   :  { %457 = vmatprep.subr.bf16.mxu1 %v1791_v18  ;;  %v225_v9 = vrot.slane %v1579_v6, %v2364_v7  ;;  %v232_v10 = vrot.slane %v218_v8, %v2364_v7 }
  0x9a   :  { %p2140_p4 = pnand %p2139_p3, %p2133_p0 }
  0x9b   :  { %731 = vmatpush1.bf16.msra.mxu0 %v1830_v45  ;;  %v234_v11 = vpack.i.b16 %v225_v9, %v225_v9  ;;  %v241_v13 = vpack.i.b16 %v232_v10, %v232_v10  ;;  %v1887_v45 = vld [vmem:[#allocation10 + $0x70] ss:$8 sps:$4 sm:$0xff]  }
  0x9c   :  { %458 = vmatpush1.bf16.msra.mxu1 %v1793_v19  ;;  %732 = vmatprep.subr.bf16.mxu0 %v1835_v46  ;;  %v1892_v46 = vld [vmem:[#allocation10 + $0x84] ss:$8 sps:$4 sm:$0xff]  }
  0x9d   :  { %459 = vmatprep.subr.bf16.mxu1 %v1794_v20  ;;  %v239_v16 = vrot.slane %v234_v11, %v2368_v12  ;;  %v246_v18 = vrot.slane %v241_v13, %v2368_v12 }
  0x9f   :  { %733 = vmatpush1.bf16.msra.mxu0 %v1833_v47  ;;  %v1890_v47 = vld [vmem:[#allocation10 + $0x80] ss:$8 sps:$4 sm:$0xff]  }
  0xa0   :  { %460 = vmatpush1.bf16.msra.mxu1 %v1796_v21  ;;  %734 = vmatprep.subr.bf16.mxu0 %v1838_v48  ;;  %v1895_v48 = vld [vmem:[#allocation10 + $0x94] ss:$8 sps:$4 sm:$0xff]  }
  0xa1   :  { %461 = vmatprep.subr.bf16.mxu1 %v1797_v22 }
  0xa3   :  { %735 = vmatpush1.bf16.msra.mxu0 %v1836_v49  ;;  %v1893_v49 = vld [vmem:[#allocation10 + $0x90] ss:$8 sps:$4 sm:$0xff]  }
  0xa4   :  { %462 = vmatpush1.bf16.msra.mxu1 %v1799_v23  ;;  %736 = vmatprep.subr.bf16.mxu0 %v1841_v50  ;;  %v1898_v50 = vld [vmem:[#allocation10 + $0xa4] ss:$8 sps:$4 sm:$0xff]  }
  0xa5   :  { %463 = vmatprep.subr.bf16.mxu1 %v1800_v24 }
  0xa7   :  { %737 = vmatpush1.bf16.msra.mxu0 %v1839_v51  ;;  %v1896_v51 = vld [vmem:[#allocation10 + $0xa0] ss:$8 sps:$4 sm:$0xff]  }
  0xa8   :  { %464 = vmatpush1.bf16.msra.mxu1 %v1802_v25  ;;  %738 = vmatprep.subr.bf16.mxu0 %v1844_v52  ;;  %v1901_v52 = vld [vmem:[#allocation10 + $0xb4] ss:$8 sps:$4 sm:$0xff]  }
  0xa9   :  { %465 = vmatprep.subr.bf16.mxu1 %v1803_v26  ;;  %v1862_v26 = vld [vmem:[#allocation8 + $0xe4] ss:$8 sps:$4 sm:$0xff]  }
  0xab   :  { %739 = vmatpush1.bf16.msra.mxu0 %v1842_v53  ;;  %v1899_v53 = vld [vmem:[#allocation10 + $0xb0] ss:$8 sps:$4 sm:$0xff]  }
  0xac   :  { %466 = vmatpush1.bf16.msra.mxu1 %v1805_v27  ;;  %740 = vmatprep.subr.bf16.mxu0 %v1847_v54  ;;  %v1860_v27 = vld [vmem:[#allocation8 + $0xe0] ss:$8 sps:$4 sm:$0xff]   ;;  %v1904_v54 = vld [vmem:[#allocation10 + $0xc4] ss:$8 sps:$4 sm:$0xff]  }
  0xad   :  { %467 = vmatprep.subr.bf16.mxu1 %v1806_v28  ;;  %v1865_v28 = vld [vmem:[#allocation8 + $0xf4] ss:$8 sps:$4 sm:$0xff]  }
  0xaf   :  { %741 = vmatpush1.bf16.msra.mxu0 %v1845_v55  ;;  %v1902_v55 = vld [vmem:[#allocation10 + $0xc0] ss:$8 sps:$4 sm:$0xff]  }
  0xb0   :  { %468 = vmatpush1.bf16.msra.mxu1 %v1808_v29  ;;  %742 = vmatprep.subr.bf16.mxu0 %v1850_v56  ;;  %v1863_v29 = vld [vmem:[#allocation8 + $0xf0] ss:$8 sps:$4 sm:$0xff]   ;;  %v1907_v56 = vld [vmem:[#allocation10 + $0xd4] ss:$8 sps:$4 sm:$0xff]  }
  0xb1   :  { %469 = vmatprep.subr.bf16.mxu1 %v1809_v30  ;;  %v1866_v30 = vld [vmem:[#allocation10] ss:$8 sps:$4 sm:$0xff]  }
  0xb3   :  { %743 = vmatpush1.bf16.msra.mxu0 %v1848_v57  ;;  %v1905_v57 = vld [vmem:[#allocation10 + $0xd0] ss:$8 sps:$4 sm:$0xff]  }
  0xb4   :  { %470 = vmatpush1.bf16.msra.mxu1 %v1811_v31  ;;  %744 = vmatprep.subr.bf16.mxu0 %v1853_v58  ;;  %v1868_v31 = vld [vmem:[#allocation10 + $0x4] ss:$8 sps:$4 sm:$0xff]   ;;  %v1612_v58 = vld.sshfl [vmem:[%s2433_s4] sm:$0x11 pattern:$0x75316420] }
  0xb5   :  { %471 = vmatprep.subr.bf16.mxu1 %v1812_v32  ;;  %v1871_v32 = vld [vmem:[#allocation10 + $0x14] ss:$8 sps:$4 sm:$0xff]  }
  0xb7   :  { %745 = vmatpush1.bf16.msra.mxu0 %v1851_v59  ;;  %v497_v59 = vcombine.high %v1612_v58, %v1612_v58 }
  0xb8   :  { %472 = vmatpush1.bf16.msra.mxu1 %v1814_v33  ;;  %746 = vmatprep.subr.bf16.mxu0 %v1856_v60  ;;  %v1869_v33 = vld [vmem:[#allocation10 + $0x10] ss:$8 sps:$4 sm:$0xff]   ;;  %v504_v60 = vrot.slane %v1612_v58, %v2364_v7 }
  0xb9   :  { %473 = vmatprep.subr.bf16.mxu1 %v1815_v34  ;;  %v1874_v34 = vld [vmem:[#allocation10 + $0x24] ss:$8 sps:$4 sm:$0xff]  }
  0xbb   :  { %747 = vmatpush1.bf16.msra.mxu0 %v1854_v61  ;;  %v511_v61 = vrot.slane %v497_v59, %v2364_v7 }
  0xbc   :  { %474 = vmatpush1.bf16.msra.mxu1 %v1817_v35  ;;  %748 = vmatprep.subr.bf16.mxu0 %v1859_v62  ;;  %v1872_v35 = vld [vmem:[#allocation10 + $0x20] ss:$8 sps:$4 sm:$0xff]   ;;  %v513_v62 = vpack.i.b16 %v504_v60, %v504_v60 }
  0xbd   :  { %1001 = vmatprep.subr.bf16.mxu1 %v1868_v31  ;;  %v1934_v31 = vld [vmem:[#allocation11 + $0x64] ss:$8 sps:$4 sm:$0xff]  }
  0xbe   :  { %v518_v3 = vrot.slane %v513_v62, %v2368_v12 }
  0xbf   :  { %749 = vmatpush1.bf16.msra.mxu0 %v1857_v63  ;;  %v520_v63 = vpack.i.b16 %v511_v61, %v511_v61 }
  0xc0   :  { %750 = vmatprep.subr.bf16.mxu0 %v1862_v26  ;;  %v1923_v26 = vld [vmem:[#allocation11 + $0x30] ss:$8 sps:$4 sm:$0xff]  }
  0xc1   :  { %v525_v5 = vrot.slane %v520_v63, %v2368_v12 }
  0xc3   :  { %751 = vmatpush1.bf16.msra.mxu0 %v1860_v27  ;;  %v1928_v27 = vld [vmem:[#allocation11 + $0x44] ss:$8 sps:$4 sm:$0xff]  }
  0xc4   :  { %752 = vmatprep.subr.bf16.mxu0 %v1865_v28  ;;  %v1926_v28 = vld [vmem:[#allocation11 + $0x40] ss:$8 sps:$4 sm:$0xff]  }
  0xc7   :  { %753 = vmatpush1.bf16.msra.mxu0 %v1863_v29  ;;  %v1931_v29 = vld [vmem:[#allocation11 + $0x54] ss:$8 sps:$4 sm:$0xff]  }
 0x155   :  { %v198_v14 = vpop.f32.mrb[0].mxu0 }
 0x156   :  { %v200_v15 = vpop.f32.mrb[1].mxu0 }
 0x157   :  { %v202_v17 = vpop.f32.mrb[2].mxu0 }
 0x158   :  { %v207_v19 = vpack.c.bf16 %v202_v17, %v198_v14  ;;  %v204_v20 = vpop.f32.mrb[3].mxu0  ;;  %v1913_v17 = vld [vmem:[#allocation10 + $0xf4] ss:$8 sps:$4 sm:$0xff]  }
 0x159   :  { %v208_v21 = vpack.c.bf16 %v204_v20, %v200_v15  ;;  %v1910_v15 = vld [vmem:[#allocation10 + $0xe4] ss:$8 sps:$4 sm:$0xff]  }
 0x15a   :  { %v247_v22 = vadd.bf16 %v239_v16, %v207_v19  ;;  %v1908_v16 = vld [vmem:[#allocation10 + $0xe0] ss:$8 sps:$4 sm:$0xff]   ;;  %v1916_v20 = vld [vmem:[#allocation11 + $0x4] ss:$8 sps:$4 sm:$0xff]  }
 0x15b   :  { %v248_v23 = vadd.bf16 %v246_v18, %v208_v21  ;;  %v1911_v18 = vld [vmem:[#allocation10 + $0xf0] ss:$8 sps:$4 sm:$0xff]   ;;  %v1914_v19 = vld [vmem:[#allocation11] ss:$8 sps:$4 sm:$0xff]   ;;  %v1919_v21 = vld [vmem:[#allocation11 + $0x14] ss:$8 sps:$4 sm:$0xff]   ;;  %1280 = vmatprep.subr.bf16.mxu0 %v1916_v20 }
 0x15c   :  { %v249_v25 = vmax.bf16 %v2175_v0, %v247_v22  ;;  %v1917_v22 = vld [vmem:[#allocation11 + $0x10] ss:$8 sps:$4 sm:$0xff]  }
 0x15d   :  { %v250_v24 = vmax.bf16 %v2175_v0, %v248_v23  ;;  %v1922_v23 = vld [vmem:[#allocation11 + $0x24] ss:$8 sps:$4 sm:$0xff]  }
 0x15f   :  { %475 = vmatprep.mubr.bf16.mxu1 %v250_v24  ;;  %v1920_v24 = vld [vmem:[#allocation11 + $0x20] ss:$8 sps:$4 sm:$0xff]  }
 0x160   :  { %476 = vmatmul.mubr.bf16.vlgmr.msra.gmra.mrb[0].mxu1 %v249_v25  ;;  %v1925_v25 = vld [vmem:[#allocation11 + $0x34] ss:$8 sps:$4 sm:$0xff]  }
 0x161   :  { %1002 = vmatpush1.bf16.msra.mxu1 %v1866_v30  ;;  %v1929_v30 = vld [vmem:[#allocation11 + $0x50] ss:$8 sps:$4 sm:$0xff]  }
 0x162   :  { %1003 = vmatprep.subr.bf16.mxu1 %v1871_v32  ;;  %v1932_v32 = vld [vmem:[#allocation11 + $0x60] ss:$8 sps:$4 sm:$0xff]  }
 0x165   :  { %1004 = vmatpush1.bf16.msra.mxu1 %v1869_v33  ;;  %v1937_v33 = vld [vmem:[#allocation11 + $0x74] ss:$8 sps:$4 sm:$0xff]  }
 0x166   :  { %1005 = vmatprep.subr.bf16.mxu1 %v1874_v34  ;;  %v1935_v34 = vld [vmem:[#allocation11 + $0x70] ss:$8 sps:$4 sm:$0xff]  }
 0x169   :  { %1006 = vmatpush1.bf16.msra.mxu1 %v1872_v35  ;;  %v1940_v35 = vld [vmem:[#allocation11 + $0x84] ss:$8 sps:$4 sm:$0xff]  }
 0x16a   :  { %1007 = vmatprep.subr.bf16.mxu1 %v1877_v36  ;;  %v1938_v36 = vld [vmem:[#allocation11 + $0x80] ss:$8 sps:$4 sm:$0xff]  }
 0x16d   :  { %1008 = vmatpush1.bf16.msra.mxu1 %v1875_v37  ;;  %v1943_v37 = vld [vmem:[#allocation11 + $0x94] ss:$8 sps:$4 sm:$0xff]  }
 0x16e   :  { %1009 = vmatprep.subr.bf16.mxu1 %v1880_v38  ;;  %v1941_v38 = vld [vmem:[#allocation11 + $0x90] ss:$8 sps:$4 sm:$0xff]  }
 0x171   :  { %1010 = vmatpush1.bf16.msra.mxu1 %v1878_v39  ;;  %v1946_v39 = vld [vmem:[#allocation11 + $0xa4] ss:$8 sps:$4 sm:$0xff]  }
 0x172   :  { %1011 = vmatprep.subr.bf16.mxu1 %v1883_v40  ;;  %v1944_v40 = vld [vmem:[#allocation11 + $0xa0] ss:$8 sps:$4 sm:$0xff]  }
 0x175   :  { %1012 = vmatpush1.bf16.msra.mxu1 %v1881_v41  ;;  %v1949_v41 = vld [vmem:[#allocation11 + $0xb4] ss:$8 sps:$4 sm:$0xff]  }
 0x176   :  { %1013 = vmatprep.subr.bf16.mxu1 %v1886_v42  ;;  %v1947_v42 = vld [vmem:[#allocation11 + $0xb0] ss:$8 sps:$4 sm:$0xff]  }
 0x179   :  { %1014 = vmatpush1.bf16.msra.mxu1 %v1884_v43  ;;  %v1952_v43 = vld [vmem:[#allocation11 + $0xc4] ss:$8 sps:$4 sm:$0xff]  }
 0x17a   :  { %1015 = vmatprep.subr.bf16.mxu1 %v1889_v44  ;;  %v1950_v44 = vld [vmem:[#allocation11 + $0xc0] ss:$8 sps:$4 sm:$0xff]  }
 0x17d   :  { %1016 = vmatpush1.bf16.msra.mxu1 %v1887_v45  ;;  %v1955_v45 = vld [vmem:[#allocation11 + $0xd4] ss:$8 sps:$4 sm:$0xff]  }
 0x17e   :  { %1017 = vmatprep.subr.bf16.mxu1 %v1892_v46  ;;  %v1953_v46 = vld [vmem:[#allocation11 + $0xd0] ss:$8 sps:$4 sm:$0xff]  }
 0x181   :  { %1018 = vmatpush1.bf16.msra.mxu1 %v1890_v47  ;;  %v1645_v47 = vld.sshfl [vmem:[%s2435_s6] sm:$0x11 pattern:$0x75316420] }
 0x182   :  { %1019 = vmatprep.subr.bf16.mxu1 %v1895_v48  ;;  %v776_v48 = vcombine.high %v1645_v47, %v1645_v47 }
 0x185   :  { %1020 = vmatpush1.bf16.msra.mxu1 %v1893_v49  ;;  %v783_v49 = vrot.slane %v1645_v47, %v2364_v7 }
 0x186   :  { %1021 = vmatprep.subr.bf16.mxu1 %v1898_v50  ;;  %v790_v50 = vrot.slane %v776_v48, %v2364_v7 }
 0x189   :  { %1022 = vmatpush1.bf16.msra.mxu1 %v1896_v51  ;;  %v792_v51 = vpack.i.b16 %v783_v49, %v783_v49 }
 0x18a   :  { %1023 = vmatprep.subr.bf16.mxu1 %v1901_v52  ;;  %v799_v52 = vpack.i.b16 %v790_v50, %v790_v50 }
 0x18d   :  { %1024 = vmatpush1.bf16.msra.mxu1 %v1899_v53 }
 0x18e   :  { %1025 = vmatprep.subr.bf16.mxu1 %v1904_v54 }
 0x191   :  { %1026 = vmatpush1.bf16.msra.mxu1 %v1902_v55  ;;  %v797_v55 = vrot.slane %v792_v51, %v2368_v12 }
 0x192   :  { %1027 = vmatprep.subr.bf16.mxu1 %v1907_v56 }
 0x195   :  { %1028 = vmatpush1.bf16.msra.mxu1 %v1905_v57  ;;  %v804_v57 = vrot.slane %v799_v52, %v2368_v12 }
 0x196   :  { %1029 = vmatprep.subr.bf16.mxu1 %v1910_v15  ;;  %v1969_v15 = vld [vmem:[#allocation13 + $0x18] sm:$0xff]  }
 0x199   :  { %1030 = vmatpush1.bf16.msra.mxu1 %v1908_v16  ;;  %v1970_v16 = vld [vmem:[#allocation13 + $0x60] sm:$0xff]  }
 0x19a   :  { %1031 = vmatprep.subr.bf16.mxu1 %v1913_v17  ;;  %v1971_v17 = vld [vmem:[#allocation13 + $0x20] sm:$0xff]  }
 0x19d   :  { %1032 = vmatpush1.bf16.msra.mxu1 %v1911_v18  ;;  %v1972_v18 = vld [vmem:[#allocation13 + $0x68] sm:$0xff]  }
 0x233   :  { %v477_v1 = vpop.f32.mrb[0].mxu1 }
 0x234   :  { %v479_v2 = vpop.f32.mrb[1].mxu1 }
 0x235   :  { %v481_v4 = vpop.f32.mrb[2].mxu1 }
 0x236   :  { %v486_v6 = vpack.c.bf16 %v481_v4, %v477_v1  ;;  %v483_v8 = vpop.f32.mrb[3].mxu1  ;;  %v1961_v4 = vld [vmem:[#allocation11 + $0xf4] ss:$8 sps:$4 sm:$0xff]  }
 0x237   :  { %v487_v9 = vpack.c.bf16 %v483_v8, %v479_v2  ;;  %v1958_v2 = vld [vmem:[#allocation11 + $0xe4] ss:$8 sps:$4 sm:$0xff]  }
 0x238   :  { %v526_v10 = vadd.bf16 %v518_v3, %v486_v6  ;;  %v1956_v3 = vld [vmem:[#allocation11 + $0xe0] ss:$8 sps:$4 sm:$0xff]  }
 0x239   :  { %v527_v11 = vadd.bf16 %v525_v5, %v487_v9  ;;  %v1959_v5 = vld [vmem:[#allocation11 + $0xf0] ss:$8 sps:$4 sm:$0xff]   ;;  %v1962_v6 = vld [vmem:[#allocation13 + $0x40] sm:$0xff]   ;;  %v1964_v9 = vld [vmem:[#allocation13 + $0x48] sm:$0xff]  }
 0x23a   :  { %v528_v14 = vmax.bf16 %v2175_v0, %v526_v10  ;;  %v1963_v8 = vld [vmem:[#allocation13] sm:$0xff]   ;;  %1730 = vmatprep.subr.bf16.mxu1 %v1962_v6  ;;  %v1965_v10 = vld [vmem:[#allocation13 + $0x8] sm:$0xff]  }
 0x23b   :  { %v529_v13 = vmax.bf16 %v2175_v0, %v527_v11  ;;  %v1966_v11 = vld [vmem:[#allocation13 + $0x50] sm:$0xff]  }
 0x23d   :  { %754 = vmatprep.mubr.bf16.mxu0 %v529_v13  ;;  %v1967_v13 = vld [vmem:[#allocation13 + $0x10] sm:$0xff]  }
 0x23e   :  { %755 = vmatmul.mubr.bf16.vlgmr.msra.gmra.mrb[4].mxu0 %v528_v14  ;;  %v1968_v14 = vld [vmem:[#allocation13 + $0x58] sm:$0xff]  }
 0x23f   :  { %1281 = vmatpush1.bf16.msra.mxu0 %v1914_v19  ;;  %v1678_v19 = vld.sshfl [vmem:[%s2437_s8] sm:$0x11 pattern:$0x75316420] }
 0x240   :  { %1282 = vmatprep.subr.bf16.mxu0 %v1919_v21  ;;  %v1055_v20 = vcombine.high %v1678_v19, %v1678_v19  ;;  %v1062_v21 = vrot.slane %v1678_v19, %v2364_v7 }
 0x243   :  { %1283 = vmatpush1.bf16.msra.mxu0 %v1917_v22  ;;  %v1069_v22 = vrot.slane %v1055_v20, %v2364_v7 }
 0x244   :  { %1284 = vmatprep.subr.bf16.mxu0 %v1922_v23  ;;  %v1071_v23 = vpack.i.b16 %v1062_v21, %v1062_v21 }
 0x247   :  { %1285 = vmatpush1.bf16.msra.mxu0 %v1920_v24  ;;  %v1078_v24 = vpack.i.b16 %v1069_v22, %v1069_v22 }
 0x248   :  { %1286 = vmatprep.subr.bf16.mxu0 %v1925_v25 }
 0x24b   :  { %1287 = vmatpush1.bf16.msra.mxu0 %v1923_v26 }
 0x24c   :  { %1288 = vmatprep.subr.bf16.mxu0 %v1928_v27  ;;  %v1076_v27 = vrot.slane %v1071_v23, %v2368_v12 }
 0x24f   :  { %1289 = vmatpush1.bf16.msra.mxu0 %v1926_v28 }
 0x250   :  { %1290 = vmatprep.subr.bf16.mxu0 %v1931_v29  ;;  %v1083_v29 = vrot.slane %v1078_v24, %v2368_v12 }
 0x253   :  { %1291 = vmatpush1.bf16.msra.mxu0 %v1929_v30 }
 0x254   :  { %1292 = vmatprep.subr.bf16.mxu0 %v1934_v31 }
 0x257   :  { %1293 = vmatpush1.bf16.msra.mxu0 %v1932_v32 }
 0x258   :  { %1294 = vmatprep.subr.bf16.mxu0 %v1937_v33 }
 0x25b   :  { %1295 = vmatpush1.bf16.msra.mxu0 %v1935_v34 }
 0x25c   :  { %1296 = vmatprep.subr.bf16.mxu0 %v1940_v35 }
 0x25f   :  { %1297 = vmatpush1.bf16.msra.mxu0 %v1938_v36 }
 0x260   :  { %1298 = vmatprep.subr.bf16.mxu0 %v1943_v37  ;;  %v1973_v37 = vld [vmem:[#allocation13 + $0x28] sm:$0xff]  }
 0x263   :  { %1299 = vmatpush1.bf16.msra.mxu0 %v1941_v38  ;;  %v1974_v38 = vld [vmem:[#allocation13 + $0x70] sm:$0xff]  }
 0x264   :  { %1300 = vmatprep.subr.bf16.mxu0 %v1946_v39  ;;  %v1975_v39 = vld [vmem:[#allocation13 + $0x30] sm:$0xff]  }
 0x267   :  { %1301 = vmatpush1.bf16.msra.mxu0 %v1944_v40  ;;  %v1976_v40 = vld [vmem:[#allocation13 + $0x78] sm:$0xff]  }
 0x268   :  { %1302 = vmatprep.subr.bf16.mxu0 %v1949_v41  ;;  %v1977_v41 = vld [vmem:[#allocation13 + $0x38] sm:$0xff]  }
 0x26b   :  { %1303 = vmatpush1.bf16.msra.mxu0 %v1947_v42  ;;  %v1711_v42 = vld.sshfl [vmem:[%s2439_s10] sm:$0x11 pattern:$0x75316420] }
 0x26c   :  { %1304 = vmatprep.subr.bf16.mxu0 %v1952_v43  ;;  %v1334_v43 = vcombine.high %v1711_v42, %v1711_v42 }
 0x26f   :  { %1305 = vmatpush1.bf16.msra.mxu0 %v1950_v44  ;;  %v1341_v44 = vrot.slane %v1711_v42, %v2364_v7 }
 0x270   :  { %1306 = vmatprep.subr.bf16.mxu0 %v1955_v45  ;;  %v1348_v45 = vrot.slane %v1334_v43, %v2364_v7  ;;  %v1537_v7 = vld [vmem:[%s2441_s12] sm:$0x1] }
 0x272   :  { %v1357_v47 = vpack.i.b16 %v1348_v45, %v1348_v45 }
 0x273   :  { %1307 = vmatpush1.bf16.msra.mxu0 %v1953_v46  ;;  %v1350_v46 = vpack.i.b16 %v1341_v44, %v1341_v44 }
 0x274   :  { %1308 = vmatprep.subr.bf16.mxu0 %v1958_v2  ;;  %v1362_v52 = vrot.slane %v1357_v47, %v2368_v12 }
 0x275   :  { %v1355_v50 = vrot.slane %v1350_v46, %v2368_v12 }
 0x277   :  { %1309 = vmatpush1.bf16.msra.mxu0 %v1956_v3 }
 0x278   :  { %1310 = vmatprep.subr.bf16.mxu0 %v1961_v4 }
 0x27b   :  { %1311 = vmatpush1.bf16.msra.mxu0 %v1959_v5 }
 0x311   :  { %v756_v53 = vpop.f32.mrb[4].mxu0 }
 0x312   :  { %v758_v54 = vpop.f32.mrb[5].mxu0 }
 0x313   :  { %v760_v56 = vpop.f32.mrb[6].mxu0 }
 0x314   :  { %v765_v58 = vpack.c.bf16 %v760_v56, %v756_v53  ;;  %v762_v59 = vpop.f32.mrb[7].mxu0 }
 0x315   :  { %v766_v60 = vpack.c.bf16 %v762_v59, %v758_v54 }
 0x316   :  { %v805_v61 = vadd.bf16 %v797_v55, %v765_v58 }
 0x317   :  { %v806_v62 = vadd.bf16 %v804_v57, %v766_v60 }
 0x318   :  { %v807_v1 = vmax.bf16 %v2175_v0, %v805_v61  ;;  %v1539_v61 = vpack.i.b16 %v1537_v7, %v1537_v7 }
 0x319   :  { %v808_v63 = vmax.bf16 %v2175_v0, %v806_v62 }
 0x31a   :  { %v1544_v4 = vrot.slane %v1539_v61, %v2368_v12 }
 0x31b   :  { %1033 = vmatprep.mubr.bf16.mxu1 %v808_v63 }
 0x31c   :  { %1034 = vmatmul.mubr.bf16.vlgmr.msra.gmra.mrb[4].mxu1 %v807_v1 }
 0x31d   :  { %1731 = vmatpush3.bf16.msra.mxu1 %v1963_v8 }
 0x31e   :  { %1732 = vmatprep.subr.bf16.mxu1 %v1964_v9 }
 0x321   :  { %1733 = vmatpush3.bf16.msra.mxu1 %v1965_v10 }
 0x322   :  { %1734 = vmatprep.subr.bf16.mxu1 %v1966_v11 }
 0x325   :  { %1735 = vmatpush3.bf16.msra.mxu1 %v1967_v13 }
 0x326   :  { %1736 = vmatprep.subr.bf16.mxu1 %v1968_v14 }
 0x329   :  { %1737 = vmatpush3.bf16.msra.mxu1 %v1969_v15 }
 0x32a   :  { %1738 = vmatprep.subr.bf16.mxu1 %v1970_v16 }
 0x32d   :  { %1739 = vmatpush3.bf16.msra.mxu1 %v1971_v17 }
 0x32e   :  { %1740 = vmatprep.subr.bf16.mxu1 %v1972_v18 }
 0x331   :  { %1741 = vmatpush3.bf16.msra.mxu1 %v1973_v37 }
 0x332   :  { %1742 = vmatprep.subr.bf16.mxu1 %v1974_v38 }
 0x335   :  { %1743 = vmatpush3.bf16.msra.mxu1 %v1975_v39 }
 0x336   :  { %1744 = vmatprep.subr.bf16.mxu1 %v1976_v40 }
 0x339   :  { %1745 = vmatpush3.bf16.msra.mxu1 %v1977_v41 }
 0x3ef   :  { %v1035_v25 = vpop.f32.mrb[4].mxu1 }
 0x3f0   :  { %v1037_v26 = vpop.f32.mrb[5].mxu1 }
 0x3f1   :  { %v1039_v28 = vpop.f32.mrb[6].mxu1 }
 0x3f2   :  { %v1044_v30 = vpack.c.bf16 %v1039_v28, %v1035_v25  ;;  %v1041_v31 = vpop.f32.mrb[7].mxu1 }
 0x3f3   :  { %v1045_v32 = vpack.c.bf16 %v1041_v31, %v1037_v26 }
 0x3f4   :  { %v1084_v33 = vadd.bf16 %v1076_v27, %v1044_v30 }
 0x3f5   :  { %v1085_v34 = vadd.bf16 %v1083_v29, %v1045_v32 }
 0x3f6   :  { %v1086_v36 = vmax.bf16 %v2175_v0, %v1084_v33 }
 0x3f7   :  { %v1087_v35 = vmax.bf16 %v2175_v0, %v1085_v34 }
 0x3f9   :  { %1312 = vmatprep.mubr.bf16.mxu0 %v1087_v35 }
 0x3fa   :  { %1313 = vmatmul.mubr.bf16.vlgmr.msra.gmra.mrb[8].mxu0 %v1086_v36 }
 0x4cd   :  { %v1314_v48 = vpop.f32.mrb[8].mxu0 }
 0x4ce   :  { %v1316_v49 = vpop.f32.mrb[9].mxu0 }
 0x4cf   :  { %v1318_v51 = vpop.f32.mrb[10].mxu0 }
 0x4d0   :  { %v1323_v53 = vpack.c.bf16 %v1318_v51, %v1314_v48  ;;  %v1320_v54 = vpop.f32.mrb[11].mxu0 }
 0x4d1   :  { %v1324_v55 = vpack.c.bf16 %v1320_v54, %v1316_v49 }
 0x4d2   :  { %v1363_v56 = vadd.bf16 %v1355_v50, %v1323_v53 }
 0x4d3   :  { %v1364_v57 = vadd.bf16 %v1362_v52, %v1324_v55 }
 0x4d4   :  { %v1365_v59 = vmax.bf16 %v2175_v0, %v1363_v56 }
 0x4d5   :  { %v1366_v58 = vmax.bf16 %v2175_v0, %v1364_v57 }
 0x4d7   :  { %1527 = vmatprep.mubr.bf16.mxu1 %v1366_v58 }
 0x4d8   :  { %1528 = vmatmul.mubr.bf16.vlgmr.msra.gmra.mrb[8].mxu1 %v1365_v59 }
 0x5ab   :  { %v1746_v60 = vpop.f32.mrb[8].mxu1 }
 0x5ac   :  { %v1747_v62 = vpop.f32.mrb[9].mxu1 }
 0x5ad   :  { %v1748_v63 = vadd.f32 %v1747_v62, %v1746_v60  ;;  %v1749_v1 = vpop.f32.mrb[10].mxu1 }
 0x5ae   :  { %v1750_v2 = vpop.f32.mrb[11].mxu1 }
 0x5af   :  { %v1751_v3 = vadd.f32 %v1750_v2, %v1749_v1 }
 0x5b1   :  { %v1536_v5 = vpack.c.bf16 %v1751_v3, %v1748_v63 }
 0x5b3   :  { %v1545_v6 = vadd.bf16 %v1544_v4, %v1536_v5 }
 0x5b5   :  { %v1728_v0 = vcombine.low %v1545_v6, %v1545_v6  ;;  %v1729_v8 = vcombine.high %v1545_v6, %v1545_v6 }
 0x5b7   :  { %1553 = vst [vmem:[#allocation14] sm:$0xf] %v1728_v0  ;;  %1554 = vst [vmem:[#allocation14 + $0x4] sm:$0xf] %v1729_v8 }
 0x5b8   :  { %2143 = shalt.err (!%p2140_p4)
}
 0x5b9   :  { %s2144_s17 = scalar_lea.hbm %s2442_s13, 128 }
 0x5ba   :  { %p2145_p5 = scmp.ne.s32.totalorder %s2442_s13, %s2144_s17  ;;  %p2148_p6 = scmp.lt.u32.totalorder %s2144_s17, %s2442_s13 }
 0x5bc   :  { %p2150_p7 = pnand %p2148_p6, %p2145_p5 }
 0x5be   :  { %2153 = shalt.err (!%p2150_p7)
}
 0x5bf   :  { %1566 = dma.vmem_to_hbm [thread:$0]  %s1561_s3, 128, %s2442_s13, [#allocation4], %s2170_s9, %s2170_s9, %s2171_s25  }
 0x5c0   :  { %2162 = dma.done.wait [#allocation4], 128  }
 0x5c1   :  { %2163 = vsyncadd [#allocation4], 4294967168 }
 0x5c2   :  { %1570 = vsyncpa [#allocation3], 1 }
 0x5c3   :  { %1571 = vsyncpa [#allocation6], 1 }
 0x5c4   :  { %1572 = vsyncpa [#allocation9], 1 }
 0x5c5   :  { %1573 = vsyncpa [#allocation12], 1 }
 0x5c6   :  { %1574 = vsyncpa [#allocation4], 1 }

</bundles_post_ra>
